<compile_context>
chip_gen: v7x
topology: tpu7x:2x2x1
jax: 0.10.0
libtpu: 0.0.40
codegen_flags: <defaults>
</compile_context>

<pallas_src>
import functools

import jax
import jax.numpy as jnp
from jax.experimental import pallas as pl
from jax.experimental.pallas import tpu as pltpu

_LANES = 128
_MAX_TILE_ROWS = 2048   # (2048, 128) f32 = 1 MiB per input per grid step
_N_SPLITS = 2           # outer "parallel" axis (2 TCs on v7x; harmless elsewhere)


def _round_up(a, b):
    return ((a + b - 1) // b) * b


def _mixloss_kernel(x_ref, y_ref, l1_ref, sq_ref, *, rows, tile_rows,
                    inner_blocks):
    """Accumulates per-(sublane, lane) partial sums of |d| and d^2."""
    p = pl.program_id(0)   # parallel slice
    i = pl.program_id(1)   # reduction step within the slice

    # Output blocks stay resident in VMEM across the inner reduction axis and
    # double as the accumulators (one (8, 128) partial per parallel slice).
    @pl.when(i == 0)
    def _init():
        l1_ref[...] = jnp.zeros_like(l1_ref)
        sq_ref[...] = jnp.zeros_like(sq_ref)

    d = x_ref[...].astype(jnp.float32) - y_ref[...].astype(jnp.float32)

    # Mask rows beyond the real array: the ragged last block and the possibly
    # clamped/duplicated block of the second parallel slice.  Mask d itself so
    # it applies before both the abs and the square accumulation.
    block_idx = p * inner_blocks + i
    row0 = block_idx * tile_rows
    row_ids = row0 + jax.lax.broadcasted_iota(jnp.int32, (tile_rows, _LANES), 0)
    d = jnp.where(row_ids < rows, d, jnp.float32(0.0))

    # Per-(sublane, lane) partials: pure VPU (vreg-wise) adds, no XLU reduce.
    d3 = d.reshape(tile_rows // 8, 8, _LANES)
    l1_ref[0] += jnp.sum(jnp.abs(d3), axis=0)
    sq_ref[0] += jnp.sum(d3 * d3, axis=0)


def mix_loss(x, y, losses_and_weights=(("l1", 0.5), ("mse", 0.5))):
    """JAX/Pallas equivalent of MixLoss(L1Loss(), w0, MSELoss(), w1)(x, y).

    Supported loss names: "l1" (mean abs error), "mse" (mean squared error).
    Returns a float32 scalar.
    """
    w_l1 = 0.0
    w_mse = 0.0
    for name, w in losses_and_weights:
        if name == "l1":
            w_l1 += float(w)
        elif name == "mse":
            w_mse += float(w)
        else:
            # TODO(synk): only element-wise L1/MSE mean losses are fused here.
            raise NotImplementedError(f"unsupported loss: {name}")

    assert x.shape == y.shape, (x.shape, y.shape)
    n_elems = int(x.size)

    xf = x.reshape(-1)
    yf = y.reshape(-1)

    # Lane-aligned bulk goes through the kernel (no padded copies); the
    # (<128 element) ragged tail, if any, is handled with plain jnp.
    n_main = (n_elems // _LANES) * _LANES
    rows = n_main // _LANES

    sum_l1 = jnp.float32(0.0)
    sum_sq = jnp.float32(0.0)

    if rows > 0:
        x2 = xf[:n_main].reshape(rows, _LANES)
        y2 = yf[:n_main].reshape(rows, _LANES)

        tile_rows = min(_MAX_TILE_ROWS, _round_up(rows, 8))
        blocks = pl.cdiv(rows, tile_rows)
        inner_blocks = pl.cdiv(blocks, _N_SPLITS)

        def in_map(p, i):
            # Clamp so the DMA never targets a block entirely past the array;
            # the in-kernel row mask zeroes any duplicated/overhanging rows.
            return (jnp.minimum(p * inner_blocks + i, blocks - 1), 0)

        kernel = functools.partial(
            _mixloss_kernel, rows=rows, tile_rows=tile_rows,
            inner_blocks=inner_blocks)

        acc_shape = jax.ShapeDtypeStruct((_N_SPLITS, 8, _LANES), jnp.float32)
        l1_part, sq_part = pl.pallas_call(
            kernel,
            out_shape=(acc_shape, acc_shape),
            grid_spec=pl.GridSpec(
                grid=(_N_SPLITS, inner_blocks),
                in_specs=[
                    pl.BlockSpec((tile_rows, _LANES), in_map),
                    pl.BlockSpec((tile_rows, _LANES), in_map),
                ],
                out_specs=(
                    pl.BlockSpec((1, 8, _LANES), lambda p, i: (p, 0, 0)),
                    pl.BlockSpec((1, 8, _LANES), lambda p, i: (p, 0, 0)),
                ),
            ),
            compiler_params=pltpu.CompilerParams(
                dimension_semantics=("parallel", "arbitrary")),
        )(x2, y2)
        sum_l1 = sum_l1 + jnp.sum(l1_part)
        sum_sq = sum_sq + jnp.sum(sq_part)

    if n_main < n_elems:
        dt = xf[n_main:].astype(jnp.float32) - yf[n_main:].astype(jnp.float32)
        sum_l1 = sum_l1 + jnp.sum(jnp.abs(dt))
        sum_sq = sum_sq + jnp.sum(dt * dt)

    inv_n = jnp.float32(1.0 / n_elems)
    return (jnp.float32(w_l1) * sum_l1 + jnp.float32(w_mse) * sum_sq) * inv_n


if __name__ == "__main__":
    key = jax.random.PRNGKey(0)
    kx, ky = jax.random.split(key)
    # NCHW inputs, as in the PyTorch module's typical usage.
    x = jax.random.normal(kx, (2, 4, 16, 16), dtype=jnp.float32)
    y = jax.random.normal(ky, (2, 4, 16, 16), dtype=jnp.float32)

    loss = jax.block_until_ready(mix_loss(x, y))

    # Pure-JAX reference: 0.5 * L1 + 0.5 * MSE (both 'mean' reduction).
    d = x - y
    ref = 0.5 * jnp.mean(jnp.abs(d)) + 0.5 * jnp.mean(d * d)
    assert jnp.allclose(loss, ref, rtol=1e-5, atol=1e-6), (loss, ref)

    print("KERNEL_OK")
</pallas_src>

<mosaic_0001>
module attributes {stable_mosaic.version = 11 : i64} {
  func.func @_mixloss_kernel(%arg0: i32, %arg1: i32, %arg2: memref<16x128xf32, #tpu.memory_space<vmem>>, %arg3: memref<16x128xf32, #tpu.memory_space<vmem>>, %arg4: memref<1x8x128xf32, #tpu.memory_space<vmem>>, %arg5: memref<1x8x128xf32, #tpu.memory_space<vmem>>) attributes {dimension_semantics = [#tpu.dimension_semantics<parallel>, #tpu.dimension_semantics<arbitrary>], iteration_bounds = array<i64: 2, 1>, scalar_prefetch = 0 : i64, scratch_operands = 0 : i64, tpu.core_type = #tpu.core_type<tc>, window_params = [{transform_indices = @transform_0, window_bounds = array<i64: 16, 128>}, {transform_indices = @transform_1, window_bounds = array<i64: 16, 128>}, {transform_indices = @transform_2, window_bounds = array<i64: 1, 8, 128>}, {transform_indices = @transform_3, window_bounds = array<i64: 1, 8, 128>}]} {
    %c0_i32 = arith.constant 0 : i32
    %0 = arith.cmpi eq, %arg1, %c0_i32 : i32
    %1 = arith.extui %0 : i1 to i32
    %c0_i32_0 = arith.constant 0 : i32
    %2 = arith.cmpi ne, %1, %c0_i32_0 : i32
    scf.if %2 {
      %cst_19 = arith.constant 0.000000e+00 : f32
      %33 = vector.broadcast %cst_19 : f32 to vector<1x8x128xf32>
      %c0_20 = arith.constant 0 : index
      %c0_21 = arith.constant 0 : index
      %c0_22 = arith.constant 0 : index
      %34 = vector.load %arg4[%c0_20, %c0_21, %c0_22] : memref<1x8x128xf32, #tpu.memory_space<vmem>>, vector<1x8x128xf32>
      tpu.vector_store %arg4[%c0_20, %c0_21, %c0_22], %33 {strides = array<i32>} : memref<1x8x128xf32, #tpu.memory_space<vmem>>, vector<1x8x128xf32>,
      %cst_23 = arith.constant 0.000000e+00 : f32
      %35 = vector.broadcast %cst_23 : f32 to vector<1x8x128xf32>
      %c0_24 = arith.constant 0 : index
      %c0_25 = arith.constant 0 : index
      %c0_26 = arith.constant 0 : index
      %36 = vector.load %arg5[%c0_24, %c0_25, %c0_26] : memref<1x8x128xf32, #tpu.memory_space<vmem>>, vector<1x8x128xf32>
      tpu.vector_store %arg5[%c0_24, %c0_25, %c0_26], %35 {strides = array<i32>} : memref<1x8x128xf32, #tpu.memory_space<vmem>>, vector<1x8x128xf32>,
    } else {
    }
    %c0 = arith.constant 0 : index
    %c0_1 = arith.constant 0 : index
    %3 = vector.load %arg2[%c0, %c0_1] : memref<16x128xf32, #tpu.memory_space<vmem>>, vector<16x128xf32>
    %c0_2 = arith.constant 0 : index
    %c0_3 = arith.constant 0 : index
    %4 = vector.load %arg3[%c0_2, %c0_3] : memref<16x128xf32, #tpu.memory_space<vmem>>, vector<16x128xf32>
    %5 = arith.subf %3, %4 : vector<16x128xf32>
    %c1_i32 = arith.constant 1 : i32
    %6 = arith.muli %arg0, %c1_i32 : i32
    %7 = arith.addi %6, %arg1 : i32
    %c16_i32 = arith.constant 16 : i32
    %8 = arith.muli %7, %c16_i32 : i32
    %9 = tpu.iota {dimensions = array<i32: 0>} : vector<16x128xi32>
    %10 = vector.broadcast %8 : i32 to vector<16x128xi32>
    %11 = arith.addi %10, %9 : vector<16x128xi32>
    %c16_i32_4 = arith.constant 16 : i32
    %12 = vector.broadcast %c16_i32_4 : i32 to vector<16x128xi32>
    %13 = arith.cmpi slt, %11, %12 : vector<16x128xi32>
    %cst = arith.constant 0.000000e+00 : f32
    %14 = vector.broadcast %cst : f32 to vector<16x128xf32>
    %15 = arith.select %13, %5, %14 : vector<16x128xi1>, vector<16x128xf32>
    %16 = vector.shape_cast %15 : vector<16x128xf32> to vector<2x8x128xf32>
    %c0_5 = arith.constant 0 : index
    %c0_6 = arith.constant 0 : index
    %c0_7 = arith.constant 0 : index
    %17 = vector.load %arg4[%c0_5, %c0_6, %c0_7] : memref<1x8x128xf32, #tpu.memory_space<vmem>>, vector<1x8x128xf32>
    %18 = vector.shape_cast %17 : vector<1x8x128xf32> to vector<8x128xf32>
    %19 = math.absf %16 : vector<2x8x128xf32>
    %cst_8 = arith.constant dense<0.000000e+00> : vector<8x128xf32>
    %20 = vector.multi_reduction <add>, %19, %cst_8 [0] : vector<2x8x128xf32> to vector<8x128xf32>
    %21 = arith.addf %18, %20 : vector<8x128xf32>
    %c0_9 = arith.constant 0 : index
    %c0_10 = arith.constant 0 : index
    %c0_11 = arith.constant 0 : index
    %22 = vector.load %arg4[%c0_9, %c0_10, %c0_11] : memref<1x8x128xf32, #tpu.memory_space<vmem>>, vector<1x8x128xf32>
    %23 = vector.shape_cast %22 : vector<1x8x128xf32> to vector<8x128xf32>
    %24 = vector.shape_cast %21 : vector<8x128xf32> to vector<1x8x128xf32>
    tpu.vector_store %arg4[%c0_9, %c0_10, %c0_11], %24 {strides = array<i32>} : memref<1x8x128xf32, #tpu.memory_space<vmem>>, vector<1x8x128xf32>,
    %c0_12 = arith.constant 0 : index
    %c0_13 = arith.constant 0 : index
    %c0_14 = arith.constant 0 : index
    %25 = vector.load %arg5[%c0_12, %c0_13, %c0_14] : memref<1x8x128xf32, #tpu.memory_space<vmem>>, vector<1x8x128xf32>
    %26 = vector.shape_cast %25 : vector<1x8x128xf32> to vector<8x128xf32>
    %27 = arith.mulf %16, %16 : vector<2x8x128xf32>
    %cst_15 = arith.constant dense<0.000000e+00> : vector<8x128xf32>
    %28 = vector.multi_reduction <add>, %27, %cst_15 [0] : vector<2x8x128xf32> to vector<8x128xf32>
    %29 = arith.addf %26, %28 : vector<8x128xf32>
    %c0_16 = arith.constant 0 : index
    %c0_17 = arith.constant 0 : index
    %c0_18 = arith.constant 0 : index
    %30 = vector.load %arg5[%c0_16, %c0_17, %c0_18] : memref<1x8x128xf32, #tpu.memory_space<vmem>>, vector<1x8x128xf32>
    %31 = vector.shape_cast %30 : vector<1x8x128xf32> to vector<8x128xf32>
    %32 = vector.shape_cast %29 : vector<8x128xf32> to vector<1x8x128xf32>
    tpu.vector_store %arg5[%c0_16, %c0_17, %c0_18], %32 {strides = array<i32>} : memref<1x8x128xf32, #tpu.memory_space<vmem>>, vector<1x8x128xf32>,
    return
  }
  func.func @transform_0(%arg0: i32, %arg1: i32) -> (i32, i32) {
    %c1_i32 = arith.constant 1 : i32
    %0 = arith.muli %arg0, %c1_i32 : i32
    %1 = arith.addi %0, %arg1 : i32
    %c0_i32 = arith.constant 0 : i32
    %2 = arith.minsi %1, %c0_i32 : i32
    %c0_i32_0 = arith.constant 0 : i32
    %c0_i32_1 = arith.constant 0 : i32
    return %2, %c0_i32_0 : i32, i32
  }
  func.func @transform_1(%arg0: i32, %arg1: i32) -> (i32, i32) {
    %c1_i32 = arith.constant 1 : i32
    %0 = arith.muli %arg0, %c1_i32 : i32
    %1 = arith.addi %0, %arg1 : i32
    %c0_i32 = arith.constant 0 : i32
    %2 = arith.minsi %1, %c0_i32 : i32
    %c0_i32_0 = arith.constant 0 : i32
    %c0_i32_1 = arith.constant 0 : i32
    return %2, %c0_i32_0 : i32, i32
  }
  func.func @transform_2(%arg0: i32, %arg1: i32) -> (i32, i32, i32) {
    %c0_i32 = arith.constant 0 : i32
    %c0_i32_0 = arith.constant 0 : i32
    %c0_i32_1 = arith.constant 0 : i32
    return %arg0, %c0_i32, %c0_i32_0 : i32, i32, i32
  }
  func.func @transform_3(%arg0: i32, %arg1: i32) -> (i32, i32, i32) {
    %c0_i32 = arith.constant 0 : i32
    %c0_i32_0 = arith.constant 0 : i32
    %c0_i32_1 = arith.constant 0 : i32
    return %arg0, %c0_i32, %c0_i32_0 : i32, i32, i32
  }
}

</mosaic_0001>

<bundles_post_ra>
// kernel: tpu_custom_call.1
= control target key start
LH: loop header
LB: loop body
LE: loop exit
PB: predicated region body
PF: predicated region fallthrough
CT: control target
= control target key end

     0   :  { %9 = vsyncpa [#allocation3], 0  ;;  %s1066_s0 = inlined_call_operand.hbm [shape: f32[16,128], index: 0, kind: input, shape index: {}]   ;;  %s1067_s1 = inlined_call_operand.hbm [shape: f32[16,128], index: 1, kind: input, shape index: {}]   ;;  %s1068_s2 = inlined_call_operand.hbm [shape: f32[2,8,128], index: 2, kind: output, shape index: {0}]   ;;  %s1069_s3 = inlined_call_operand.hbm [shape: f32[2,8,128], index: 3, kind: output, shape index: {1}]  }
   0x1   :  { %11 = vsyncpa [#allocation3 + $0x1], 0 }
   0x2   :  { %12 = vsyncpa [#allocation6], 0 }
   0x3   :  { %14 = vsyncpa [#allocation6 + $0x1], 0 }
   0x4   :  { %15 = vsyncpa [#allocation4], 0 }
   0x5   :  { %17 = vsyncpa [#allocation4 + $0x1], 0 }
   0x6   :  { %18 = vsyncpa [#allocation9], 0 }
   0x7   :  { %20 = vsyncpa [#allocation9 + $0x1], 0  ;;  %s829_s12 = smov 0   ;;  %s831_s13 = smov 0  }
   0x8   :  { %s833_s14 = smov 0   ;;  %s835_s15 = smov 0  }
   0x9   :  { %s837_s16 = smov 0   ;;  %s839_s17 = smov 0  }
   0xa   :  { %s841_s18 = smov 0   ;;  %s843_s19 = smov 0  }
   0xb LB: > { %s479_s20 = sadd.s32 4294967295, %s801_s19   ;;  %s480_s21 = sadd.s32 4294967294, %s801_s19   ;;  %s801_s19 = sphi %s843_s19, %s26_s19   ;;  %s797_s18 = sphi %s841_s18, %s1088_s18   ;;  %s793_s17 = sphi %s839_s17, %s1087_s17   ;;  %s789_s16 = sphi %s837_s16, %s1056_s16   ;;  %s785_s15 = sphi %s835_s15, %s1086_s15   ;;  %s781_s14 = sphi %s833_s14, %s1085_s14   ;;  %s777_s13 = sphi %s831_s13, %s1084_s13   ;;  %s773_s12 = sphi %s829_s12, %s1083_s12  }
   0xc   : > { %s38_s22 = sadd.s32 1, %s797_s18  ;;  %p770_p1 = scmp.ne.s32.totalorder %s789_s16, 0 }
   0xd   : > { %p40_p0 = scmp.ge.s32.totalorder %s38_s22, 2  ;;  %p59_p2 = scmp.eq.s32.totalorder %s801_s19, 0 }
   0xe   : > { %p64_p3 = scmp.ne.s32.totalorder %s789_s16, %s785_s15  ;;  %p65_p5 = scmp.eq.s32.totalorder %s479_s20, 0 }
   0xf   : > { %s1090_s22 = smov (%p40_p0, %s38_s22), 0  ;;  %p875_p4 = por %p770_p1, %p59_p2 }
  0x10   : > { %p879_p6 = por %p65_p5, %p64_p3  ;;  %s106_s25 = ssub.s32 %s797_s18, %s1090_s22 }
  0x11   : > { %p107_p7 = scmp.eq.s32.totalorder %s106_s25, 0  ;;  %s109_s26 = sadd.s32 1, %s781_s14 }
  0x12   : > { %s1073_s24 = scalar_select %p879_p6, 1, 0 }
  0x13   : > { %s887_s27 = scalar_select %p107_p7, %s781_s14, %s109_s26  }
  0x14   : > { %p119_p8 = scmp.ne.s32.totalorder %s781_s14, %s777_s13  ;;  %p120_p9 = scmp.eq.s32.totalorder %s479_s20, 1 }
  0x15   : > { %p125_p10 = scmp.ne.s32.totalorder %s777_s13, %s773_s12  ;;  %p126_p11 = scmp.eq.s32.totalorder %s480_s21, 1 }
  0x16   : > { %p893_p12 = por %p120_p9, %p119_p8  ;;  %p525_p1 = scmp.lt.s32.totalorder %s801_s19, 2 }
  0x17   : > { %p898_p0 = por %p126_p11, %p125_p10  ;;  %s803_s30 = smov [#allocation2]  }
  0x18   : > { %s1074_s28 = scalar_select %p893_p12, 1, 0 }
  0x19   : > { %s1075_s29 = scalar_select %p898_p0, 1, 0 }
  0x1a   : > { %s186_s4 = sshll.u32 %s803_s30, 4  ;;  %p905_p2 = pnand %p525_p1, %p875_p4  ;;  %s187_s4 = int_to_ptr.vmem [resolvable:$true] %s186_s4 }
  0x1b   : > { %s602_s8 = scalar_lea.hbm %s1066_s0, 256 }
  0x1c   : > { %p603_p3 = scmp.ne.s32.totalorder %s1066_s0, %s602_s8  ;;  %p604_p5 = pneg %p905_p2 }
  0x1d   : > { %p609_p8 = scmp.lt.u32.totalorder %s602_s8, %s602_s8  ;;  %p611_p9 = scmp.lt.u32.totalorder %s602_s8, %s1066_s0 }
  0x1e   : > { %p605_p7 = pnand %p604_p5, %p603_p3 }
  0x1f   : > { %p612_p10 = por %p611_p9, %p609_p8 }
  0x20   : > { %p606_p4 = pneg %p605_p7 }
  0x22   : > { %p613_p11 = pnand %p612_p10, %p606_p4 }
  0x24   : > { %616 = shalt.err (!%p613_p11)
}
  0x25   : > { %s617_s20 = scalar_lea.vmem %s187_s4, 256  ;;  %s624_s21 = scalar_lea.vmem %s187_s4, 512 }
  0x26   : > { %p618_p1 = scmp.ne.s32.totalorder %s187_s4, %s617_s20  ;;  %p625_p12 = scmp.lt.s32.totalorder %s187_s4, %s187_s4 }
  0x27   : > { %p626_p6 = scmp.lt.s32.totalorder %s624_s21, %s617_s20 }
  0x28   : > { %p620_p13 = pnand %p618_p1, %p604_p5 }
  0x29   : > { %p627_p3 = por %p626_p6, %p625_p12 }
  0x2a   : > { %p621_p0 = pneg %p620_p13 }
  0x2c   : > { %p628_p7 = pnand %p627_p3, %p621_p0 }
  0x2e   : > { %631 = shalt.err (!%p628_p7)
}
  0x2f   : > { %s804_s23 = smov 128   ;;  %s805_s25 = smov 8  }
  0x30   : > { %514 = dma.hbm_to_vmem [thread:$0]  (!%p905_p2), %s1066_s0, 256, %s187_s4, [#allocation3], %s804_s23, %s804_s23, %s805_s25  }
  0x31   : > { %p489_p13 = scmp.ge.s32.totalorder %s801_s19, 1  ;;  %p218_p4 = scmp.lt.s32.totalorder %s801_s19, 3 }
  0x32   : > { %s806_s7 = smov [#allocation5]   ;;  %s632_s11 = scalar_lea.hbm %s1067_s1, 256 }
  0x33   : > { %p936_p8 = pnand %p489_p13, %p218_p4  ;;  %s210_s8 = sshll.u32 %s806_s7, 4  ;;  %s211_s8 = int_to_ptr.vmem [resolvable:$true] %s210_s8 }
  0x34   : > { %p633_p6 = scmp.ne.s32.totalorder %s1067_s1, %s632_s11  ;;  %p639_p9 = scmp.lt.u32.totalorder %s632_s11, %s632_s11 }
  0x35   : > { %s1077_s6 = scalar_select %p936_p8, 1, 0 }
  0x36   : > { %p635_p12 = pnand %p633_p6, %p604_p5  ;;  %p641_p10 = scmp.lt.u32.totalorder %s632_s11, %s1067_s1 }
  0x38   : > { %p636_p0 = pneg %p635_p12  ;;  %p642_p11 = por %p641_p10, %p639_p9 }
  0x3a   : > { %p643_p1 = pnand %p642_p11, %p636_p0 }
  0x3c   : > { %646 = shalt.err (!%p643_p1)
}
  0x3d   : > { %s647_s26 = scalar_lea.vmem %s211_s8, 256  ;;  %s654_s30 = scalar_lea.vmem %s211_s8, 512 }
  0x3e   : > { %p648_p3 = scmp.ne.s32.totalorder %s211_s8, %s647_s26  ;;  %p655_p4 = scmp.lt.s32.totalorder %s211_s8, %s211_s8 }
  0x3f   : > { %p656_p8 = scmp.lt.s32.totalorder %s654_s30, %s647_s26 }
  0x40   : > { %p650_p7 = pnand %p648_p3, %p604_p5 }
  0x41   : > { %p657_p6 = por %p656_p8, %p655_p4 }
  0x42   : > { %p651_p13 = pneg %p650_p7 }
  0x44   : > { %p658_p12 = pnand %p657_p6, %p651_p13 }
  0x46   : > { %661 = shalt.err (!%p658_p12)
}
  0x47   : > { %517 = dma.hbm_to_vmem [thread:$0]  (!%p905_p2), %s1067_s1, 256, %s211_s8, [#allocation6], %s804_s23, %s804_s23, %s805_s25  }
  0x48   : > { %p1078_p0 = scmp.ne.s32.totalorder %s1077_s6, 0 }
  0x49   : > { %s224_s10 = sand.u32 (!%p1078_p0), 1, %s789_s16   ;;  %p1079_p5 = scmp.ne.s32.totalorder (!%p1078_p0), %s1073_s24, 0 }
  0x4a   : > { %222 = sbr.rel (%p1078_p0) target bundleno = 136 (0x88), region = 28  ;;  %s490_s11 = sshll.u32 (!%p1078_p0), %s224_s10, 4 }
  0x4b   : > { %s225_s15 = scalar_lea.sflag (!%p1078_p0), [#allocation3], %s224_s10  ;;  %s228_s20 = scalar_lea.vmem (!%p1078_p0), [#allocation2], %s490_s11 }
  0x51   : > { %755 = dma.done.wait (%p1079_p5), %s225_s15, 256  }
  0x52   : > { %757 = vsyncadd (%p1079_p5), %s225_s15, 4294967040  ;;  %s234_s5 = scalar_lea.sflag [#allocation6], %s224_s10  ;;  %s237_s4 = scalar_lea.vmem [#allocation5], %s490_s11 }
  0x53   : > { %759 = dma.done.wait (%p1079_p5), %s234_s5, 256  }
  0x54   : > { %761 = vsyncadd (%p1079_p5), %s234_s5, 4294967040  ;;  %s494_s23 = sshll.u32 %s793_s17, 4  ;;  %v292_v0 = vlaneseq  ;;  %s976_s25 = sand.u32 1, %s777_s13   ;;  %v284_v6 = vld [vmem:[%s228_s20] sm:$0xff]  ;;  %v285_v7 = vld [vmem:[%s228_s20 + $0x8] sm:$0xff] }
  0x55   : > { %v295_v1 = vstv %s494_s23  ;;  %s492_s6 = sshll.u32 %s976_s25, 3  ;;  %v286_v8 = vld [vmem:[%s237_s4] sm:$0xff]  ;;  %v287_v9 = vld [vmem:[%s237_s4 + $0x8] sm:$0xff]  ;;  %s497_s24 = sshll.u32 %s793_s17, 7 }
  0x56   : > { %v293_v2 = vshrl.u32 %v292_v0, 7  ;;  %v288_v10 = vsub.f32 %v284_v6, %v286_v8  ;;  %v289_v11 = vsub.f32 %v285_v7, %v287_v9  ;;  %s262_s8 = scalar_lea.vmem [#allocation7], %s492_s6  ;;  %s269_s26 = scalar_lea.vmem [#allocation8], %s492_s6 }
  0x57   : > { %s333_s21 = sshll.u32 %s262_s8, 4  ;;  %s346_s30 = sshll.u32 %s269_s26, 4  ;;  %s985_s21 = int_to_ptr.vmem [resolvable:$true] %s333_s21  ;;  %s992_s30 = int_to_ptr.vmem [resolvable:$true] %s346_s30 }
  0x58   : > { %v294_v3 = vadd.s32 8, %v293_v2  ;;  %v296_v4 = vadd.s32 %v295_v1, %v293_v2  ;;  %s983_s10 = scalar_lea.hbm %s1068_s2, %s497_s24  ;;  %s990_s17 = scalar_lea.hbm %s1069_s3, %s497_s24 }
  0x59   : > { %s315_s20 = scalar_lea.sflag [#allocation4], %s976_s25  ;;  %s662_s5 = scalar_lea.vmem %s985_s21, 128 }
  0x5a   : > { %v297_v5 = vadd.s32 %v295_v1, %v294_v3  ;;  %vm298_vm0 = vcmp.lt.s32.totalorder %v296_v4, 16  ;;  %p663_p2 = scmp.ne.s32.totalorder %s985_s21, %s662_s5  ;;  %p1080_p8 = scmp.ne.s32.totalorder %s1074_s28, 0 }
  0x5b   : > { %v300_v12 = vsel %vm298_vm0, %v288_v10, 0.0  ;;  %s807_s4 = smov [#allocation7]  }
  0x5c   : > { %vm299_vm1 = vcmp.lt.s32.totalorder %v297_v5, 16  ;;  %v303_v14 = vand.u32 2147483647, %v300_v12  ;;  %v309_v15 = vmul.f32 %v300_v12, %v300_v12  ;;  %p664_p9 = pnand %p663_p2, %p1080_p8  ;;  %s666_s23 = sshll.u32 %s807_s4, 4  ;;  %s667_s23 = int_to_ptr.vmem [resolvable:$false] %s666_s23 }
  0x5d   : > { %v301_v13 = vsel %vm299_vm1, %v289_v11, 0.0  ;;  %s668_s6 = scalar_lea.vmem %s667_s23, 256  ;;  %p669_p11 = scmp.lt.s32.totalorder %s985_s21, %s667_s23 }
  0x5e   : > { %v304_v16 = vand.u32 2147483647, %v301_v13  ;;  %v310_v17 = vmul.f32 %v301_v13, %v301_v13  ;;  %p665_p10 = pneg %p664_p9  ;;  %p670_p1 = scmp.lt.s32.totalorder %s668_s6, %s662_s5 }
  0x60   : > { %v305_v18 = vadd.f32 %v304_v16, %v303_v14  ;;  %v311_v19 = vadd.f32 %v310_v17, %v309_v15  ;;  %p671_p3 = por %p670_p1, %p669_p11 }
  0x62   : > { %307 = vst [vmem:[%s262_s8] sm:$0xff] %v305_v18  ;;  %313 = vst [vmem:[%s269_s26] sm:$0xff] %v311_v19  ;;  %p672_p7 = pnand %p671_p3, %p665_p10 }
  0x64   : > { %675 = shalt.err (!%p672_p7)
}
  0x65   : > { %s676_s24 = scalar_lea.hbm %s983_s10, 128  ;;  %s680_s7 = scalar_lea.hbm %s1068_s2, 256 }
  0x66   : > { %p677_p13 = scmp.ne.s32.totalorder %s983_s10, %s676_s24  ;;  %p681_p12 = scmp.lt.u32.totalorder %s983_s10, %s1068_s2 }
  0x67   : > { %p682_p0 = scmp.lt.u32.totalorder %s680_s7, %s676_s24  ;;  %p684_p2 = scmp.lt.u32.totalorder %s676_s24, %s983_s10 }
  0x68   : > { %p678_p4 = pnand %p677_p13, %p1080_p8 }
  0x69   : > { %p683_p5 = por %p682_p0, %p681_p12 }
  0x6a   : > { %p679_p6 = pneg %p678_p4 }
  0x6b   : > { %p685_p9 = por %p684_p2, %p683_p5 }
  0x6d   : > { %p686_p10 = pnand %p685_p9, %p679_p6 }
  0x6f   : > { %689 = shalt.err (!%p686_p10)
}
  0x70   : > { %507 = dma.vmem_to_hbm [thread:$0]  (%p1080_p8), %s985_s21, 128, %s983_s10, %s315_s20  }
  0x71   : > { %s320_s15 = scalar_lea.sflag [#allocation9], %s976_s25  ;;  %s690_s5 = scalar_lea.vmem %s992_s30, 128 }
  0x72   : > { %p691_p11 = scmp.ne.s32.totalorder %s992_s30, %s690_s5  ;;  %s808_s4 = smov [#allocation8]  }
  0x73   : > { %s694_s23 = sshll.u32 %s808_s4, 4  ;;  %s695_s23 = int_to_ptr.vmem [resolvable:$false] %s694_s23 }
  0x74   : > { %p692_p1 = pnand %p691_p11, %p1080_p8  ;;  %s696_s6 = scalar_lea.vmem %s695_s23, 256 }
  0x75   : > { %p697_p7 = scmp.lt.s32.totalorder %s992_s30, %s695_s23  ;;  %p698_p13 = scmp.lt.s32.totalorder %s696_s6, %s690_s5 }
  0x76   : > { %p693_p3 = pneg %p692_p1 }
  0x77   : > { %p699_p4 = por %p698_p13, %p697_p7 }
  0x79   : > { %p700_p6 = pnand %p699_p4, %p693_p3 }
  0x7b   : > { %703 = shalt.err (!%p700_p6)
}
  0x7c   : > { %s704_s25 = scalar_lea.hbm %s990_s17, 128  ;;  %s708_s20 = scalar_lea.hbm %s1069_s3, 256 }
  0x7d   : > { %p705_p12 = scmp.ne.s32.totalorder %s990_s17, %s704_s25  ;;  %p709_p2 = scmp.lt.u32.totalorder %s990_s17, %s1069_s3 }
  0x7e   : > { %p710_p9 = scmp.lt.u32.totalorder %s708_s20, %s704_s25  ;;  %p712_p11 = scmp.lt.u32.totalorder %s704_s25, %s990_s17 }
  0x7f   : > { %p706_p0 = pnand %p705_p12, %p1080_p8 }
  0x80   : > { %p711_p10 = por %p710_p9, %p709_p2 }
  0x81   : > { %p707_p5 = pneg %p706_p0 }
  0x82   : > { %p713_p1 = por %p712_p11, %p711_p10 }
  0x84   : > { %p714_p3 = pnand %p713_p1, %p707_p5 }
  0x86   : > { %717 = shalt.err (!%p714_p3)
}
  0x87   : > { %508 = dma.vmem_to_hbm [thread:$0]  (%p1080_p8), %s992_s30, 128, %s990_s17, %s320_s15  }
  0x88 PF: > { %s358_s26 = sand.u32 1, %s773_s12   ;;  %p1081_p7 = scmp.ne.s32.totalorder %s1075_s29, 0 }
  0x89   : > { %p1082_p13 = scmp.ge.s32.totalorder %s801_s19, 2  ;;  %s359_s7 = scalar_lea.sflag [#allocation4], %s358_s26 }
  0x8b   : > { %p519_p4 = pnand %p1082_p13, %p1081_p7 }
  0x8d   : > { %763 = dma.done.wait (!%p519_p4), %s359_s7, 128  }
  0x8e   : > { %765 = vsyncadd (!%p519_p4), %s359_s7, 4294967168  ;;  %s368_s9 = scalar_lea.sflag [#allocation9], %s358_s26 }
  0x8f   : > { %767 = dma.done.wait (!%p519_p4), %s368_s9, 128  }
  0x90   : > { %769 = vsyncadd (!%p519_p4), %s368_s9, 4294967168  ;;  %s26_s19 = sadd.s32 1, %s801_s19   ;;  %s1083_s12 = smov %s777_s13 }
  0x91   : > { %p23_p6 = scmp.ge.s32.totalorder %s26_s19, 4   ;;  %s1084_s13 = smov %s781_s14 }
  0x92   : > { %s1085_s14 = smov %s887_s27  ;;  %s1086_s15 = smov %s789_s16 }
  0x93   : > { %s1056_s16 = smov 0   ;;  %s1087_s17 = smov %s797_s18 }
  0x94   : > { %s1088_s18 = smov %s1090_s22  ;;  %25 = sbr.rel (!%p23_p6) target bundleno = 11 (0xb), region = 107 }
  0x9b   :  { %373 = vsyncpa [#allocation3], 1 }
  0x9c   :  { %375 = vsyncpa [#allocation3 + $0x1], 1 }
  0x9d   :  { %376 = vsyncpa [#allocation6], 1 }
  0x9e   :  { %378 = vsyncpa [#allocation6 + $0x1], 1 }
  0x9f   :  { %379 = vsyncpa [#allocation4], 1 }
  0xa0   :  { %381 = vsyncpa [#allocation4 + $0x1], 1 }
  0xa1   :  { %382 = vsyncpa [#allocation9], 1 }
  0xa2   :  { %384 = vsyncpa [#allocation9 + $0x1], 1 }

</bundles_post_ra>
